<compile_context>
chip_gen: v7x
topology: tpu7x:2x2x1
jax: 0.10.0
libtpu: 0.0.40
codegen_flags: <defaults>
</compile_context>

<pallas_src>
import functools

import jax
import jax.numpy as jnp
from jax.experimental import pallas as pl
from jax.experimental.pallas import tpu as pltpu


def _round_up(n, m):
    return ((n + m - 1) // m) * m


def _layernorm_kernel(x_ref, scale_ref, shift_ref, o_ref, *, eps):
    # Widen once, narrow once.
    x = x_ref[...].astype(jnp.float32)           # (row_tile, H)
    gamma = scale_ref[...].astype(jnp.float32)   # (1, H), broadcasts over rows
    beta = shift_ref[...].astype(jnp.float32)    # (1, H)

    mean = jnp.mean(x, axis=-1, keepdims=True)
    xc = x - mean
    var = jnp.mean(xc * xc, axis=-1, keepdims=True)   # biased (unbiased=False)
    inv = jax.lax.rsqrt(var + eps)                    # EUP slot

    y = xc * inv * gamma + beta
    o_ref[...] = y.astype(o_ref.dtype)


def layernorm(x, scale, shift, eps=1e-5, row_tile_max=512):
    """x: (..., H);  scale, shift: (H,).  Returns LayerNorm(x), torch semantics."""
    orig_shape = x.shape
    H = orig_shape[-1]
    x2d = x.reshape(-1, H)
    R = x2d.shape[0]

    # Row tile: multiple of 8 (sublane granularity), capped so the in/out
    # double-buffered tiles stay a few MiB total (fits v7x's 64 MiB VMEM with
    # lots of headroom while keeping per-step overhead amortized).
    row_tile = min(row_tile_max, _round_up(R, 8))
    R_pad = _round_up(R, row_tile)
    if R_pad != R:
        x2d = jnp.pad(x2d, ((0, R_pad - R), (0, 0)))

    scale2d = scale.reshape(1, H).astype(x.dtype)
    shift2d = shift.reshape(1, H).astype(x.dtype)

    itemsize = jnp.dtype(x.dtype).itemsize
    cost = pl.CostEstimate(
        flops=8 * R_pad * H,
        transcendentals=R_pad,                        # one rsqrt per row
        bytes_accessed=2 * R_pad * H * itemsize + 2 * H * itemsize,
    )

    out2d = pl.pallas_call(
        functools.partial(_layernorm_kernel, eps=eps),
        out_shape=jax.ShapeDtypeStruct((R_pad, H), x.dtype),
        grid=(R_pad // row_tile,),
        in_specs=[
            pl.BlockSpec((row_tile, H), lambda i: (i, 0)),
            pl.BlockSpec((1, H), lambda i: (0, 0)),
            pl.BlockSpec((1, H), lambda i: (0, 0)),
        ],
        out_specs=pl.BlockSpec((row_tile, H), lambda i: (i, 0)),
        compiler_params=pltpu.CompilerParams(
            dimension_semantics=("parallel",),
        ),
        cost_estimate=cost,
    )(x2d, scale2d, shift2d)

    if R_pad != R:
        out2d = out2d[:R]
    return out2d.reshape(orig_shape)


def layernorm_ref(x, scale, shift, eps=1e-5):
    mean = jnp.mean(x, axis=-1, keepdims=True)
    var = jnp.mean((x - mean) ** 2, axis=-1, keepdims=True)
    return scale * (x - mean) / jnp.sqrt(var + eps) + shift


if __name__ == "__main__":
    key = jax.random.PRNGKey(0)
    k1, k2, k3, k4 = jax.random.split(key, 4)

    # Main case from the spec: x = torch.rand(2, 4, 768).
    B, S, H = 2, 4, 768
    x = jax.random.uniform(k1, (B, S, H), dtype=jnp.float32)

    # Module-initialized parameters (scale=ones, shift=zeros), eps=1e-5.
    scale = jnp.ones((H,), dtype=jnp.float32)
    shift = jnp.zeros((H,), dtype=jnp.float32)

    out = layernorm(x, scale, shift)
    jax.block_until_ready(out)
    ref = layernorm_ref(x, scale, shift)
    assert out.shape == x.shape and out.dtype == x.dtype
    assert jnp.allclose(out, ref, atol=1e-5, rtol=1e-5)

    # Non-trivial affine parameters to exercise the scale/shift path.
    scale2 = jax.random.normal(k2, (H,), dtype=jnp.float32)
    shift2 = jax.random.normal(k3, (H,), dtype=jnp.float32)
    out2 = layernorm(x, scale2, shift2)
    jax.block_until_ready(out2)
    ref2 = layernorm_ref(x, scale2, shift2)
    assert jnp.allclose(out2, ref2, atol=1e-5, rtol=1e-5)

    # Small case from the spec: LayerNorm(emb_dim=5) on a (2, 5) batch.
    x_small = jax.random.normal(k4, (2, 5), dtype=jnp.float32)
    scale_s = jnp.ones((5,), dtype=jnp.float32)
    shift_s = jnp.zeros((5,), dtype=jnp.float32)
    out_s = layernorm(x_small, scale_s, shift_s)
    jax.block_until_ready(out_s)
    ref_s = layernorm_ref(x_small, scale_s, shift_s)
    assert jnp.allclose(out_s, ref_s, atol=1e-5, rtol=1e-5)

    print("KERNEL_OK")
</pallas_src>

<mosaic_0001>
module attributes {stable_mosaic.version = 11 : i64} {
  func.func @_layernorm_kernel(%arg0: i32, %arg1: memref<8x768xf32, #tpu.memory_space<vmem>>, %arg2: memref<1x768xf32, #tpu.memory_space<vmem>>, %arg3: memref<1x768xf32, #tpu.memory_space<vmem>>, %arg4: memref<8x768xf32, #tpu.memory_space<vmem>>) attributes {dimension_semantics = [#tpu.dimension_semantics<parallel>], iteration_bounds = array<i64: 1>, scalar_prefetch = 0 : i64, scratch_operands = 0 : i64, tpu.core_type = #tpu.core_type<tc>, window_params = [{transform_indices = @transform_0, window_bounds = array<i64: 8, 768>}, {pipeline_mode = #tpu.pipeline_mode<synchronous>, transform_indices = @transform_1, window_bounds = array<i64: 1, 768>}, {pipeline_mode = #tpu.pipeline_mode<synchronous>, transform_indices = @transform_2, window_bounds = array<i64: 1, 768>}, {transform_indices = @transform_3, window_bounds = array<i64: 8, 768>}]} {
    %c0 = arith.constant 0 : index
    %c0_0 = arith.constant 0 : index
    %0 = vector.load %arg1[%c0, %c0_0] : memref<8x768xf32, #tpu.memory_space<vmem>>, vector<8x768xf32>
    %c0_1 = arith.constant 0 : index
    %c0_2 = arith.constant 0 : index
    %1 = vector.load %arg2[%c0_1, %c0_2] : memref<1x768xf32, #tpu.memory_space<vmem>>, vector<1x768xf32>
    %c0_3 = arith.constant 0 : index
    %c0_4 = arith.constant 0 : index
    %2 = vector.load %arg3[%c0_3, %c0_4] : memref<1x768xf32, #tpu.memory_space<vmem>>, vector<1x768xf32>
    %cst = arith.constant dense<0.000000e+00> : vector<8xf32>
    %3 = vector.multi_reduction <add>, %0, %cst [1] : vector<8x768xf32> to vector<8xf32>
    %4 = vector.shape_cast %3 : vector<8xf32> to vector<8x1xf32>
    %cst_5 = arith.constant 7.680000e+02 : f32
    %5 = vector.broadcast %cst_5 : f32 to vector<8x1xf32>
    %6 = arith.divf %4, %5 : vector<8x1xf32>
    %7 = vector.broadcast %6 : vector<8x1xf32> to vector<8x768xf32>
    %8 = arith.subf %0, %7 : vector<8x768xf32>
    %9 = arith.mulf %8, %8 : vector<8x768xf32>
    %cst_6 = arith.constant dense<0.000000e+00> : vector<8xf32>
    %10 = vector.multi_reduction <add>, %9, %cst_6 [1] : vector<8x768xf32> to vector<8xf32>
    %11 = vector.shape_cast %10 : vector<8xf32> to vector<8x1xf32>
    %cst_7 = arith.constant 7.680000e+02 : f32
    %12 = vector.broadcast %cst_7 : f32 to vector<8x1xf32>
    %13 = arith.divf %11, %12 : vector<8x1xf32>
    %cst_8 = arith.constant 9.99999974E-6 : f32
    %14 = vector.broadcast %cst_8 : f32 to vector<8x1xf32>
    %15 = arith.addf %13, %14 : vector<8x1xf32>
    %16 = math.rsqrt %15 : vector<8x1xf32>
    %17 = vector.broadcast %16 : vector<8x1xf32> to vector<8x768xf32>
    %18 = arith.mulf %8, %17 : vector<8x768xf32>
    %19 = vector.broadcast %1 : vector<1x768xf32> to vector<8x768xf32>
    %20 = arith.mulf %18, %19 : vector<8x768xf32>
    %21 = vector.broadcast %2 : vector<1x768xf32> to vector<8x768xf32>
    %22 = arith.addf %20, %21 : vector<8x768xf32>
    %c0_9 = arith.constant 0 : index
    %c0_10 = arith.constant 0 : index
    %23 = vector.load %arg4[%c0_9, %c0_10] : memref<8x768xf32, #tpu.memory_space<vmem>>, vector<8x768xf32>
    tpu.vector_store %arg4[%c0_9, %c0_10], %22 {strides = array<i32>} : memref<8x768xf32, #tpu.memory_space<vmem>>, vector<8x768xf32>,
    return
  }
  func.func @transform_0(%arg0: i32) -> (i32, i32) {
    %c0_i32 = arith.constant 0 : i32
    %c0_i32_0 = arith.constant 0 : i32
    return %arg0, %c0_i32 : i32, i32
  }
  func.func @transform_1(%arg0: i32) -> (i32, i32) {
    %c0_i32 = arith.constant 0 : i32
    %c0_i32_0 = arith.constant 0 : i32
    %c0_i32_1 = arith.constant 0 : i32
    return %c0_i32, %c0_i32_0 : i32, i32
  }
  func.func @transform_2(%arg0: i32) -> (i32, i32) {
    %c0_i32 = arith.constant 0 : i32
    %c0_i32_0 = arith.constant 0 : i32
    %c0_i32_1 = arith.constant 0 : i32
    return %c0_i32, %c0_i32_0 : i32, i32
  }
  func.func @transform_3(%arg0: i32) -> (i32, i32) {
    %c0_i32 = arith.constant 0 : i32
    %c0_i32_0 = arith.constant 0 : i32
    return %arg0, %c0_i32 : i32, i32
  }
}

</mosaic_0001>

<bundles_post_ra>
// kernel: tpu_custom_call.1
= control target key start
LH: loop header
LB: loop body
LE: loop exit
PB: predicated region body
PF: predicated region fallthrough
CT: control target
= control target key end

     0   :  { %8 = vsyncpa [#allocation3], 0  ;;  %s319_s0 = inlined_call_operand.hbm [shape: f32[8,768], index: 0, kind: input, shape index: {}]   ;;  %s320_s1 = inlined_call_operand.hbm [shape: f32[1,768], index: 1, kind: input, shape index: {}]   ;;  %s321_s2 = inlined_call_operand.vmem [shape: f32[1,768], index: 2, kind: input, shape index: {}]   ;;  %s322_s3 = inlined_call_operand.hbm [shape: f32[8,768], index: 3, kind: output, shape index: {}]  }
   0x1   :  { %9 = vsyncpa [#allocation6], 0 }
   0x2   :  { %10 = vsyncpa [#allocation4], 0  ;;  %s257_s12 = smov [#allocation2]   ;;  %s258_s14 = smov [#allocation5]  }
   0x3   :  { %s17_s13 = sshll.u32 %s257_s12, 4  ;;  %s27_s15 = sshll.u32 %s258_s14, 4  ;;  %s18_s13 = int_to_ptr.vmem [resolvable:$true] %s17_s13  ;;  %s28_s15 = int_to_ptr.vmem [resolvable:$true] %s27_s15 }
   0x4   :  { %s185_s18 = scalar_lea.hbm %s319_s0, 768 }
   0x5   :  { %p186_p0 = scmp.ne.s32.totalorder %s319_s0, %s185_s18  ;;  %p189_p1 = scmp.lt.u32.totalorder %s185_s18, %s319_s0 }
   0x7   :  { %p191_p2 = pnand %p189_p1, %p186_p0 }
   0x9   :  { %194 = shalt.err (!%p191_p2)
}
   0xa   :  { %s195_s23 = scalar_lea.vmem %s18_s13, 768  ;;  %p200_p4 = scmp.lt.s32.totalorder %s18_s13, %s18_s13 }
   0xb   :  { %p196_p3 = scmp.ne.s32.totalorder %s18_s13, %s195_s23  ;;  %p201_p5 = scmp.lt.s32.totalorder %s195_s23, %s195_s23 }
   0xd   :  { %p202_p6 = por %p201_p5, %p200_p4 }
   0xf   :  { %p203_p7 = pnand %p202_p6, %p196_p3 }
  0x11   :  { %206 = shalt.err (!%p203_p7)
}
  0x12   :  { %20 = dma.hbm_to_vmem [thread:$0]  %s319_s0, 768, %s18_s13, [#allocation3]  }
  0x13   :  { %s207_s28 = scalar_lea.hbm %s320_s1, 96 }
  0x14   :  { %p208_p8 = scmp.ne.s32.totalorder %s320_s1, %s207_s28  ;;  %p211_p9 = scmp.lt.u32.totalorder %s207_s28, %s320_s1 }
  0x16   :  { %p213_p10 = pnand %p211_p9, %p208_p8 }
  0x18   :  { %216 = shalt.err (!%p213_p10)
}
  0x19   :  { %s217_s6 = scalar_lea.vmem %s28_s15, 96  ;;  %p222_p12 = scmp.lt.s32.totalorder %s28_s15, %s28_s15 }
  0x1a   :  { %p218_p11 = scmp.ne.s32.totalorder %s28_s15, %s217_s6  ;;  %p223_p13 = scmp.lt.s32.totalorder %s217_s6, %s217_s6 }
  0x1c   :  { %p224_p0 = por %p223_p13, %p222_p12 }
  0x1e   :  { %p225_p1 = pnand %p224_p0, %p218_p11 }
  0x20   :  { %228 = shalt.err (!%p225_p1)
}
  0x21   :  { %30 = dma.hbm_to_vmem [thread:$0]  %s320_s1, 96, %s28_s15, [#allocation6]  }
  0x22   :  { %251 = dma.done.wait [#allocation3], 768  }
  0x23   :  { %252 = vsyncadd [#allocation3], 4294966528 }
  0x24   :  { %253 = dma.done.wait [#allocation6], 96  }
  0x25   :  { %254 = vsyncadd [#allocation6], 4294967200  ;;  %v39_v0 = vld [vmem:[#allocation2] sm:$0xff]  ;;  %v40_v1 = vld [vmem:[#allocation2 + $0x8] sm:$0xff]  ;;  %v85_v32 = vlaneseq }
  0x26   :  { %v41_v2 = vld [vmem:[#allocation2 + $0x10] sm:$0xff]  ;;  %v47_v3 = vadd.f32 %v40_v1, %v39_v0  ;;  %v42_v4 = vld [vmem:[#allocation2 + $0x18] sm:$0xff]  ;;  %v43_v6 = vld [vmem:[#allocation2 + $0x20] sm:$0xff] }
  0x27   :  { %v44_v8 = vld [vmem:[#allocation2 + $0x28] sm:$0xff]  ;;  %v86_v34 = vshrl.u32 %v85_v32, 7  ;;  %v45_v37 = vld [vmem:[#allocation5] sm:$0x3f]  ;;  %v46_v42 = vld [vmem:[%s321_s2] sm:$0x3f] }
  0x28   :  { %v48_v5 = vadd.f32 %v47_v3, %v41_v2  ;;  %s259_s2 = smov [#allocation7]  }
  0x29   :  { %v87_v35 = vsub.s32 0, %v86_v34  ;;  %v91_v36 = vsub.s32 1, %v86_v34  ;;  %v95_v38 = vsub.s32 2, %v86_v34  ;;  %v99_v39 = vsub.s32 3, %v86_v34  ;;  %s170_s9 = sshll.u32 %s259_s2, 4  ;;  %s171_s9 = int_to_ptr.vmem [resolvable:$true] %s170_s9 }
  0x2a   :  { %v49_v7 = vadd.f32 %v48_v5, %v42_v4  ;;  %v103_v40 = vsub.s32 4, %v86_v34  ;;  %v107_v41 = vsub.s32 5, %v86_v34  ;;  %s229_s10 = scalar_lea.vmem %s171_s9, 768  ;;  %p234_p3 = scmp.lt.s32.totalorder %s171_s9, %s171_s9 }
  0x2b   :  { %v88_v43 = vrot.slane %v45_v37, %v87_v35  ;;  %v92_v44 = vrot.slane %v45_v37, %v91_v36  ;;  %v96_v45 = vrot.slane %v45_v37, %v95_v38  ;;  %v100_v46 = vrot.slane %v45_v37, %v99_v39  ;;  %p230_p2 = scmp.ne.s32.totalorder %s171_s9, %s229_s10  ;;  %p235_p4 = scmp.lt.s32.totalorder %s229_s10, %s229_s10 }
  0x2c   :  { %v50_v9 = vadd.f32 %v49_v7, %v43_v6  ;;  %v104_v47 = vrot.slane %v45_v37, %v103_v40  ;;  %v108_v48 = vrot.slane %v45_v37, %v107_v41  ;;  %v125_v50 = vrot.slane %v46_v42, %v87_v35 }
  0x2d   :  { %v129_v51 = vrot.slane %v46_v42, %v91_v36  ;;  %v133_v52 = vrot.slane %v46_v42, %v95_v38  ;;  %v137_v53 = vrot.slane %v46_v42, %v99_v39  ;;  %v141_v60 = vrot.slane %v46_v42, %v103_v40  ;;  %p236_p5 = por %p235_p4, %p234_p3 }
  0x2e   :  { %v51_v10 = vadd.f32 %v50_v9, %v44_v8  ;;  %v145_v61 = vrot.slane %v46_v42, %v107_v41 }
  0x2f   :  { %p237_p6 = pnand %p236_p5, %p230_p2 }
  0x30   :  { %52 = vadd.xlane.f32.xlu0 %v51_v10 }
  0xbd   :  { %v53_v11 = vpop.xlane.xlu0 %52 }
  0xbe   :  { %v55_v12 = vmul.f32 0.0013020834, %v53_v11 }
  0xc0   :  { %v56_v13 = vsub.f32 %v39_v0, %v55_v12  ;;  %v57_v14 = vsub.f32 %v40_v1, %v55_v12  ;;  %v58_v15 = vsub.f32 %v41_v2, %v55_v12  ;;  %v59_v16 = vsub.f32 %v42_v4, %v55_v12 }
  0xc1   :  { %v60_v19 = vsub.f32 %v43_v6, %v55_v12  ;;  %v61_v22 = vsub.f32 %v44_v8, %v55_v12 }
  0xc2   :  { %v62_v17 = vmul.f32 %v56_v13, %v56_v13  ;;  %v63_v18 = vmul.f32 %v57_v14, %v57_v14  ;;  %v64_v20 = vmul.f32 %v58_v15, %v58_v15  ;;  %v65_v23 = vmul.f32 %v59_v16, %v59_v16 }
  0xc3   :  { %v66_v25 = vmul.f32 %v60_v19, %v60_v19  ;;  %v67_v27 = vmul.f32 %v61_v22, %v61_v22 }
  0xc4   :  { %v68_v21 = vadd.f32 %v63_v18, %v62_v17 }
  0xc6   :  { %v69_v24 = vadd.f32 %v68_v21, %v64_v20 }
  0xc8   :  { %v70_v26 = vadd.f32 %v69_v24, %v65_v23 }
  0xca   :  { %v71_v28 = vadd.f32 %v70_v26, %v66_v25 }
  0xcc   :  { %v72_v29 = vadd.f32 %v71_v28, %v67_v27 }
  0xce   :  { %73 = vadd.xlane.f32.xlu0 %v72_v29 }
 0x15b   :  { %v74_v30 = vpop.xlane.xlu0 %73 }
 0x15c   :  { %v75_v31 = vmul.f32 0.0013020834, %v74_v30 }
 0x15e   :  { %v76_v33 = vadd.f32 1e-05, %v75_v31 }
 0x160   :  { %183 = vrsqrt.f32 %v76_v33 }
 0x16a   :  { %v184_v49 = vpop.eup %183 }
 0x16b   :  { %v78_v54 = vmul.f32 %v184_v49, %v56_v13  ;;  %v79_v55 = vmul.f32 %v184_v49, %v57_v14  ;;  %v80_v56 = vmul.f32 %v184_v49, %v58_v15  ;;  %v81_v57 = vmul.f32 %v184_v49, %v59_v16 }
 0x16c   :  { %v82_v58 = vmul.f32 %v184_v49, %v60_v19  ;;  %v83_v59 = vmul.f32 %v184_v49, %v61_v22 }
 0x16d   :  { %v115_v62 = vmul.f32 %v88_v43, %v78_v54  ;;  %v116_v63 = vmul.f32 %v92_v44, %v79_v55  ;;  %v117_v0 = vmul.f32 %v96_v45, %v80_v56  ;;  %v118_v1 = vmul.f32 %v100_v46, %v81_v57 }
 0x16e   :  { %v119_v2 = vmul.f32 %v104_v47, %v82_v58  ;;  %v120_v3 = vmul.f32 %v108_v48, %v83_v59 }
 0x16f   :  { %v152_v4 = vadd.f32 %v125_v50, %v115_v62  ;;  %v153_v5 = vadd.f32 %v129_v51, %v116_v63  ;;  %v154_v6 = vadd.f32 %v133_v52, %v117_v0  ;;  %v155_v7 = vadd.f32 %v137_v53, %v118_v1 }
 0x170   :  { %v156_v8 = vadd.f32 %v141_v60, %v119_v2  ;;  %v157_v9 = vadd.f32 %v145_v61, %v120_v3 }
 0x171   :  { %158 = vst [vmem:[#allocation7] sm:$0xff] %v152_v4  ;;  %159 = vst [vmem:[#allocation7 + $0x8] sm:$0xff] %v153_v5 }
 0x172   :  { %160 = vst [vmem:[#allocation7 + $0x10] sm:$0xff] %v154_v6  ;;  %161 = vst [vmem:[#allocation7 + $0x18] sm:$0xff] %v155_v7 }
 0x173   :  { %162 = vst [vmem:[#allocation7 + $0x20] sm:$0xff] %v156_v8  ;;  %163 = vst [vmem:[#allocation7 + $0x28] sm:$0xff] %v157_v9 }
 0x174   :  { %240 = shalt.err (!%p237_p6)
}
 0x175   :  { %s241_s13 = scalar_lea.hbm %s322_s3, 768 }
 0x176   :  { %p242_p7 = scmp.ne.s32.totalorder %s322_s3, %s241_s13  ;;  %p245_p8 = scmp.lt.u32.totalorder %s241_s13, %s322_s3 }
 0x178   :  { %p247_p9 = pnand %p245_p8, %p242_p7 }
 0x17a   :  { %250 = shalt.err (!%p247_p9)
}
 0x17b   :  { %173 = dma.vmem_to_hbm [thread:$0]  %s171_s9, 768, %s322_s3, [#allocation4]  }
 0x17c   :  { %255 = dma.done.wait [#allocation4], 768  }
 0x17d   :  { %256 = vsyncadd [#allocation4], 4294966528 }
 0x17e   :  { %177 = vsyncpa [#allocation3], 1 }
 0x17f   :  { %178 = vsyncpa [#allocation6], 1 }
 0x180   :  { %179 = vsyncpa [#allocation4], 1 }

</bundles_post_ra>
